<compile_context>
chip_gen: v7x
topology: tpu7x:2x2x1
jax: 0.10.0
libtpu: 0.0.40
codegen_flags: <defaults>
</compile_context>

<pallas_src>
import functools

import numpy as np
import jax
import jax.numpy as jnp
from jax.experimental import pallas as pl
from jax.experimental.pallas import tpu as pltpu

# ---------------------------------------------------------------------------
# Small synthetic problem sizes (consistent with the module's forward).
# ---------------------------------------------------------------------------
B = 8          # batch of SDE paths
T_STATE = 64   # number of latent-state timesteps in x
N_OBS = 16     # number of observation times (len(TIMES))
OBS_DIM = 4    # observed state dimension (mu.shape[0])
DT = 0.25      # solver step
SCALE = 0.1    # observation noise std

_LOG_2PI = float(np.log(2.0 * np.pi))


# ---------------------------------------------------------------------------
# Pallas kernel: masked squared-error reduction + folded Normal constants.
#
#   slab_ref : (B+2, T_STATE*OBS_DIM) f32 in VMEM
#       rows 0..B-1 : x reshaped (all timesteps, lane-dense 256-wide)
#       row  B      : mu scattered to the observed flat offsets (0 elsewhere)
#       row  B+1    : 0/1 observation mask (static pattern, built in wrapper)
#   out_ref  : (1, 1) f32 in SMEM
# ---------------------------------------------------------------------------
def _obs_ll_kernel(slab_ref, out_ref, *, b, neg_half_inv_var_over_b, const_term):
    slab = slab_ref[...]                       # one full-tile VMEM load
    x = slab[:b, :]                            # (B, n_flat)
    mu = slab[b:b + 1, :]                      # (1, n_flat) broadcast over B
    mask = slab[b + 1:b + 2, :]                # (1, n_flat) 0/1

    d = x - mu                                 # VPU
    sq = jnp.where(mask > 0.0, d * d, 0.0)     # robust masking (no 0*NaN leak)
    total = jnp.sum(sq)                        # full lane+sublane reduce (XLU)

    # mean_b sum_{t,d} Normal(mu, scale).log_prob(x) with constants folded:
    out_ref[0, 0] = neg_half_inv_var_over_b * total - const_term


# ---------------------------------------------------------------------------
# Wrapper (ObsModel.forward equivalent)
# ---------------------------------------------------------------------------
def obs_model_forward(x, theta, mu, idx, scale):
    """x: (B, T_state, obs_dim); theta: unused; mu: (obs_dim, n_obs);
    idx: static tuple of ints (= (TIMES/DT).astype(int)); scale: python float."""
    del theta  # not used by ObsModel.forward
    b, t_state, obs_dim = x.shape
    n_obs = len(idx)
    n_flat = t_state * obs_dim                 # 256 lanes -> lane-dense slab

    idx_np = np.asarray(idx, dtype=np.int64)

    # mu row: scatter mu.T (n_obs, obs_dim) into the observed timestep slots.
    # Indices are static, so this is a tiny constant-index scatter.
    mu_full = jnp.zeros((t_state, obs_dim), jnp.float32)
    mu_full = mu_full.at[idx_np, :].set(jnp.transpose(mu, (1, 0)).astype(jnp.float32))
    mu_row = mu_full.reshape(1, n_flat)

    # Static 0/1 observation mask, built in numpy -> folded as a constant.
    mask_np = np.zeros((t_state, obs_dim), np.float32)
    mask_np[idx_np, :] = 1.0
    mask_row = jnp.asarray(mask_np.reshape(1, n_flat))

    # Single (B+2, 256) input slab -> exactly one input DMA.
    slab = jnp.concatenate(
        [x.reshape(b, n_flat).astype(jnp.float32), mu_row, mask_row], axis=0)

    kernel = functools.partial(
        _obs_ll_kernel,
        b=b,
        neg_half_inv_var_over_b=float(-0.5 / (scale * scale) / b),
        const_term=float(n_obs * obs_dim * (np.log(scale) + 0.5 * _LOG_2PI)),
    )

    out = pl.pallas_call(
        kernel,
        out_shape=jax.ShapeDtypeStruct((1, 1), jnp.float32),
        # No grid: single invocation on full-array blocks.
        in_specs=[pl.BlockSpec(memory_space=pltpu.MemorySpace.VMEM)],
        out_specs=pl.BlockSpec(memory_space=pltpu.MemorySpace.SMEM),
        cost_estimate=pl.CostEstimate(
            flops=3 * b * n_flat,
            transcendentals=0,
            bytes_accessed=(b + 2) * n_flat * 4 + 4,
        ),
    )(slab)
    return out[0, 0]


# Pure-JAX reference of the same math (mirrors the PyTorch forward exactly).
def obs_model_reference(x, mu, idx, scale):
    x_obs = x[:, np.asarray(idx, dtype=np.int64), :]            # (B, n_obs, D)
    loc = jnp.transpose(mu, (1, 0))[None]                       # (1, n_obs, D)
    var = scale * scale
    ll = (-0.5 * ((x_obs - loc) ** 2) / var
          - np.log(scale) - 0.5 * _LOG_2PI)
    return jnp.mean(jnp.sum(ll, axis=(-1, -2)))


if __name__ == "__main__":
    key = jax.random.PRNGKey(0)
    kx, kmu, kth = jax.random.split(key, 3)

    # TIMES / DT -> static integer observation indices (ObsModel.get_idx).
    # (Mirrors the PyTorch module's truncating cast; exact here since 4k/0.25.)
    TIMES = np.arange(N_OBS, dtype=np.float64) * 1.0
    idx = tuple(int(i) for i in (TIMES / DT).astype(int))       # [0, 4, ..., 60]
    assert max(idx) < T_STATE

    mu = jax.random.normal(kmu, (OBS_DIM, N_OBS), jnp.float32)        # module buffer MU
    x = jax.random.normal(kx, (B, T_STATE, OBS_DIM), jnp.float32)     # SDE paths
    theta = jax.random.normal(kth, (B, 2), jnp.float32)               # unused by forward

    fwd = jax.jit(obs_model_forward, static_argnums=(3, 4))
    out = fwd(x, theta, mu, idx, float(SCALE))
    jax.block_until_ready(out)

    ref = obs_model_reference(x, mu, idx, float(SCALE))
    np.testing.assert_allclose(np.asarray(out), np.asarray(ref),
                               rtol=1e-5, atol=1e-5)
    print("KERNEL_OK")
</pallas_src>

<mosaic_0001>
module attributes {stable_mosaic.version = 11 : i64} {
  func.func @_obs_ll_kernel(%arg0: memref<10x256xf32, #tpu.memory_space<vmem>>, %arg1: memref<1x1xf32, #tpu.memory_space<smem>>) attributes {dimension_semantics = [], scalar_prefetch = 0 : i64, scratch_operands = 0 : i64, tpu.core_type = #tpu.core_type<tc>} {
    %c0 = arith.constant 0 : index
    %c0_0 = arith.constant 0 : index
    %0 = vector.load %arg0[%c0, %c0_0] : memref<10x256xf32, #tpu.memory_space<vmem>>, vector<10x256xf32>
    %1 = vector.extract_strided_slice %0 {offsets = [0, 0], sizes = [8, 256], strides = [1, 1]} : vector<10x256xf32> to vector<8x256xf32>
    %2 = vector.extract_strided_slice %0 {offsets = [8, 0], sizes = [1, 256], strides = [1, 1]} : vector<10x256xf32> to vector<1x256xf32>
    %3 = vector.extract_strided_slice %0 {offsets = [9, 0], sizes = [1, 256], strides = [1, 1]} : vector<10x256xf32> to vector<1x256xf32>
    %4 = vector.broadcast %2 : vector<1x256xf32> to vector<8x256xf32>
    %5 = arith.subf %1, %4 : vector<8x256xf32>
    %cst = arith.constant 0.000000e+00 : f32
    %6 = vector.broadcast %cst : f32 to vector<1x256xf32>
    %7 = arith.cmpf ogt, %3, %6 : vector<1x256xf32>
    %8 = arith.mulf %5, %5 : vector<8x256xf32>
    %cst_1 = arith.constant 0.000000e+00 : f32
    %9 = vector.shape_cast %7 : vector<1x256xi1> to vector<1x256xi1>
    %10 = vector.broadcast %9 : vector<1x256xi1> to vector<8x256xi1>
    %11 = vector.broadcast %cst_1 : f32 to vector<8x256xf32>
    %12 = arith.select %10, %8, %11 : vector<8x256xi1>, vector<8x256xf32>
    %13 = vector.shape_cast %12 : vector<8x256xf32> to vector<1x8x256xf32>
    %cst_2 = arith.constant dense<0.000000e+00> : vector<1xf32>
    %14 = vector.multi_reduction <add>, %13, %cst_2 [1, 2] : vector<1x8x256xf32> to vector<1xf32>
    %15 = vector.shape_cast %14 : vector<1xf32> to vector<1x1x1xf32>
    %16 = vector.extract %15[0, 0, 0] : f32 from vector<1x1x1xf32>
    %cst_3 = arith.constant -6.250000e+00 : f32
    %17 = arith.mulf %cst_3, %16 : f32
    %cst_4 = arith.constant -88.5533829 : f32
    %18 = arith.subf %17, %cst_4 : f32
    %c0_5 = arith.constant 0 : index
    %c0_6 = arith.constant 0 : index
    %19 = memref.load %arg1[%c0_5, %c0_6] : memref<1x1xf32, #tpu.memory_space<smem>>
    memref.store %18, %arg1[%c0_5, %c0_6] : memref<1x1xf32, #tpu.memory_space<smem>>
    return
  }
}

</mosaic_0001>

<bundles_post_ra>
// kernel: obs_model_forward.1
= control target key start
LH: loop header
LB: loop body
LE: loop exit
PB: predicated region body
PF: predicated region fallthrough
CT: control target
= control target key end

     0   :  { %v13_v1 = vlaneseq  ;;  %s121_s0 = inlined_call_operand.vmem [shape: f32[10,256], index: 0, kind: input, shape index: {}]   ;;  %s122_s1 = inlined_call_operand.hbm [shape: f32[1,1], index: 1, kind: output, shape index: {}]  }
   0x1   :  { %v11_v0 = vld [vmem:[%s121_s0 + $0x10] sm:$0x3]  ;;  %v12_v2 = vld [vmem:[%s121_s0 + $0x18] sm:$0x3] }
   0x2   :  { %vm23_vm0 = vcmp.gt.f32.partialorder %v11_v0, 0.0 }
   0x3   :  { %6 = vsyncpa [#allocation3], 0  ;;  %v14_v3 = vshrl.u32 %v13_v1, 7  ;;  %vm24_vm1 = vcmp.gt.f32.partialorder %v12_v2, 0.0  ;;  %v85_v4 = vmov 0   ;;  %v9_v9 = vld [vmem:[%s121_s0] sm:$0xff] }
   0x4   :  { %v27_v5 = vsel %vm23_vm0, 1, %v85_v4  ;;  %v28_v6 = vsel %vm24_vm1, 1, %v85_v4  ;;  %v10_v10 = vld [vmem:[%s121_s0 + $0x8] sm:$0xff]  ;;  %s73_s18 = scalar_lea.hbm %s122_s1, 16 }
   0x5   :  { %v15_v7 = vsub.s32 0, %v14_v3  ;;  %v31_v8 = vsub.s32 1, %v14_v3  ;;  %p74_p0 = scmp.ne.s32.totalorder %s122_s1, %s73_s18  ;;  %p77_p1 = scmp.lt.u32.totalorder %s73_s18, %s122_s1 }
   0x7   :  { %v16_v11 = vrot.slane %v11_v0, %v15_v7  ;;  %v20_v12 = vrot.slane %v12_v2, %v15_v7  ;;  %v32_v13 = vrot.slane %v27_v5, %v31_v8  ;;  %v36_v14 = vrot.slane %v28_v6, %v31_v8  ;;  %p79_p2 = pnand %p77_p1, %p74_p0 }
   0x9   :  { %v21_v15 = vsub.f32 %v9_v9, %v16_v11  ;;  %v22_v16 = vsub.f32 %v10_v10, %v20_v12  ;;  %vm37_vm2 = vcmp.eq.s32.totalorder %v32_v13, 1  ;;  %vm38_vm3 = vcmp.eq.s32.totalorder %v36_v14, 1 }
   0xb   :  { %v25_v17 = vmul.f32 %v21_v15, %v21_v15  ;;  %v26_v18 = vmul.f32 %v22_v16, %v22_v16 }
   0xd   :  { %v39_v19 = vsel %vm37_vm2, %v25_v17, 0.0  ;;  %v40_v20 = vsel %vm38_vm3, %v26_v18, 0.0 }
   0xe   :  { %v41_v21 = vadd.f32 %v40_v20, %v39_v19 }
  0x10   :  { %42 = vadd.xlane.f32.xlu0 %v41_v21 }
  0x9d   :  { %v43_v22 = vpop.xlane.xlu0 %42 }
  0x9e   :  { %v44_v23 = vrot.slane %v43_v22, 4 }
  0xa0   :  { %v45_v24 = vadd.f32 %v44_v23, %v43_v22 }
  0xa2   :  { %v46_v25 = vrot.slane %v45_v24, 2 }
  0xa4   :  { %v47_v26 = vadd.f32 %v46_v25, %v45_v24 }
  0xa6   :  { %v48_v27 = vrot.slane %v47_v26, 1 }
  0xa8   :  { %v49_v28 = vadd.f32 %v48_v27, %v47_v26 }
  0xaa   :  { %69 = vpush %v49_v28 }
  0xdb   :  { %s70_s0 = spop %69 }
  0xdc   :  { %s51_s14 = smul.f32 -6.25, %s70_s0 }
  0xde   :  { %s68_s15 = sadd.f32 88.55338, %s51_s14 }
  0xe0   :  { %54 = sst [smem:[#allocation2]] %s68_s15 }
  0xe1   :  { %82 = shalt.err (!%p79_p2)
}
  0xe2   :  { %s86_s23 = smov [#allocation2]  }
  0xe3   :  { %62 = dma.smem_to_hbm %s86_s23, 16, %s122_s1, [#allocation3]  }
  0xe4   :  { %83 = dma.done.wait [#allocation3], 16  }
  0xe5   :  { %84 = vsyncadd [#allocation3], 4294967280 }
  0xe6   :  { %66 = sfence }
  0xe7   :  { %67 = vsyncpa [#allocation3], 1 }

</bundles_post_ra>
